<compile_context>
chip_gen: v5e
topology: v5e:2x2
jax: 0.10.0
libtpu: 0.0.40
codegen_flags: <defaults>
</compile_context>

<pallas_src>
import functools

import jax
import jax.numpy as jnp
from jax import lax
from jax.experimental import pallas as pl
from jax.experimental.pallas import tpu as pltpu


def _vmem_limit_bytes():
    """Per-generation VMEM limit: half of physical VMEM, capped at 64 MiB."""
    try:
        cap = int(pltpu.get_tpu_info().vmem_capacity_bytes)
    except Exception:
        cap = 64 * 1024 * 1024  # conservative fallback (v7x-sized)
    return min(cap // 2, 64 * 1024 * 1024)


def fused_head_kernel(xt_ref, w1_ref, bias_ref, w2_ref, b2_ref, o_ref, *, w_pad):
    """One (batch, row-tile) grid step.

    xt_ref  : ((tile_h+2)*W_pad, 3*Cin) bf16  im2col-along-W row tile w/ halo
    w1_ref  : (3, 3*Cin, Cmid)          bf16  3x3 conv weight (BN scale folded)
    bias_ref: (1, Cmid)                 f32   folded BN bias (incl. conv1 bias)
    w2_ref  : (Cmid, Cout_pad)          bf16  1x1 conv weight (lane-padded)
    b2_ref  : (1, Cout_pad)             f32   1x1 conv bias   (lane-padded)
    o_ref   : (tm, Cout_pad)            bf16  output row-tile slab
    """
    tm = o_ref.shape[0]  # tile_h * W_pad output rows in this tile

    # 3x3 conv as 3 MXU matmuls (dx taps folded into K = 3*Cin); ky taps are
    # value-chained so the f32 accumulator never round-trips through VMEM.
    acc = None
    for ky in range(3):
        patch = xt_ref[pl.ds(ky * w_pad, tm), :]          # (tm, 3*Cin) bf16
        d = jnp.dot(patch, w1_ref[ky], preferred_element_type=jnp.float32)
        acc = d if acc is None else acc + d

    # BN is folded into w1; epilogue is just bias + ReLU, in f32.
    h = jnp.maximum(acc + bias_ref[...], 0.0)

    # Dropout2d(0.1): identity at inference time.

    # 1x1 conv: bf16 MXU matmul, f32 accumulation, lane-dense padded output.
    out = jnp.dot(h.astype(jnp.bfloat16), w2_ref[...],
                  preferred_element_type=jnp.float32) + b2_ref[...]
    o_ref[...] = out.astype(o_ref.dtype)                  # bf16 store


def fused_head_forward(x_nhwc, w1, b1, gamma, beta, rmean, rvar, w2, b2,
                       eps=1e-5, target_rows=512):
    """x_nhwc: (N, H, W, Cin) float32.  Weights in PyTorch layouts:
       w1: (Cmid, Cin, 3, 3), b1: (Cmid,)
       gamma/beta/rmean/rvar: (Cmid,)
       w2: (Cout, Cmid, 1, 1), b2: (Cout,)
    """
    N, H, W, cin = x_nhwc.shape
    cmid = w1.shape[0]
    cout = w2.shape[0]

    # Sublane-aligned width; row-tile height targeting ~target_rows MXU rows
    # while keeping >= 2 row tiles per batch (megacore-friendly grid).
    w_pad = ((W + 7) // 8) * 8
    tile_h = max(1, min(H, (target_rows + w_pad - 1) // w_pad))
    if tile_h >= H and H >= 2:
        tile_h = (H + 1) // 2
    n_tiles = (H + tile_h - 1) // tile_h
    h_pad = n_tiles * tile_h
    tm = tile_h * w_pad

    # Fold BN (running stats) into the conv1 weights / bias, in f32.
    scale = gamma / jnp.sqrt(rvar + eps)
    bias2d = (scale * (b1 - rmean) + beta).reshape(1, cmid).astype(jnp.float32)
    w1f = w1.astype(jnp.float32) * scale[:, None, None, None]
    # w1f[o, i, ky, kx] -> w1r[ky, kx*cin + i, o]
    w1r = jnp.transpose(w1f, (2, 3, 1, 0)).reshape(3, 3 * cin, cmid)
    w1r = w1r.astype(jnp.bfloat16)

    # 1x1 conv weights, output channels padded to a full 128-lane tile.
    cout_pad = ((cout + 127) // 128) * 128
    w2r = jnp.transpose(w2.reshape(cout, cmid), (1, 0))               # (cmid, cout)
    w2r = jnp.pad(w2r, ((0, 0), (0, cout_pad - cout))).astype(jnp.bfloat16)
    b2r = jnp.pad(b2.reshape(1, cout),
                  ((0, 0), (0, cout_pad - cout))).astype(jnp.float32)

    # Spatial zero-pad (SAME halo + alignment pad) and im2col along W
    # (dx shifts folded into channels), then gather per-row-tile halo blocks.
    x_bf = x_nhwc.astype(jnp.bfloat16)
    xpp = jnp.pad(x_bf, ((0, 0), (1, 1 + h_pad - H), (1, 1 + w_pad - W), (0, 0)))
    xw3 = jnp.concatenate(
        [xpp[:, :, 0:w_pad], xpp[:, :, 1:w_pad + 1], xpp[:, :, 2:w_pad + 2]],
        axis=-1)                                       # (N, h_pad+2, w_pad, 3*cin)
    row_idx = (jnp.arange(n_tiles) * tile_h)[:, None] + \
        jnp.arange(tile_h + 2)[None, :]                # (n_tiles, tile_h+2)
    xt = xw3[:, row_idx]                               # (N, n_tiles, tile_h+2, w_pad, 3*cin)
    xt = xt.reshape(N, n_tiles, (tile_h + 2) * w_pad, 3 * cin)

    kernel = functools.partial(fused_head_kernel, w_pad=w_pad)

    out = pl.pallas_call(
        kernel,
        out_shape=jax.ShapeDtypeStruct((N, h_pad * w_pad, cout_pad),
                                       jnp.bfloat16),
        grid=(N, n_tiles),
        in_specs=[
            # Row tile with its own halo: only a few MB resident per step.
            pl.BlockSpec((None, None, (tile_h + 2) * w_pad, 3 * cin),
                         lambda n, t: (n, t, 0, 0)),
            pl.BlockSpec((3, 3 * cin, cmid), lambda n, t: (0, 0, 0)),
            pl.BlockSpec((1, cmid), lambda n, t: (0, 0)),
            pl.BlockSpec((cmid, cout_pad), lambda n, t: (0, 0)),
            pl.BlockSpec((1, cout_pad), lambda n, t: (0, 0)),
        ],
        out_specs=pl.BlockSpec((None, tm, cout_pad), lambda n, t: (n, t, 0)),
        compiler_params=pltpu.CompilerParams(
            dimension_semantics=("parallel", "parallel"),
            vmem_limit_bytes=_vmem_limit_bytes()),
    )(xt, w1r, bias2d, w2r, b2r)

    # Lane-dense bf16 slab -> NHWC f32; dropping pads / Cout slice is XLA glue.
    out = out.reshape(N, h_pad, w_pad, cout_pad)[:, :H, :W, :cout]
    return out.astype(jnp.float32)


def reference_forward(x_nchw, w1, b1, gamma, beta, rmean, rvar, w2, b2, eps=1e-5):
    """Pure-JAX NCHW reference matching PyTorch eval semantics (f32)."""
    y = lax.conv_general_dilated(
        x_nchw, w1, window_strides=(1, 1), padding="SAME",
        dimension_numbers=("NCHW", "OIHW", "NCHW"))
    y = y + b1[None, :, None, None]
    y = gamma[None, :, None, None] * (y - rmean[None, :, None, None]) \
        / jnp.sqrt(rvar[None, :, None, None] + eps) + beta[None, :, None, None]
    y = jnp.maximum(y, 0.0)
    y = lax.conv_general_dilated(
        y, w2, window_strides=(1, 1), padding="VALID",
        dimension_numbers=("NCHW", "OIHW", "NCHW"))
    return y + b2[None, :, None, None]


if __name__ == "__main__":
    # Small shapes consistent with the module's forward.
    N, Cin, H, W = 2, 8, 16, 16
    num_classes = 19

    key = jax.random.PRNGKey(0)
    ks = jax.random.split(key, 9)

    x_nchw = jax.random.normal(ks[0], (N, Cin, H, W), dtype=jnp.float32)

    # Deterministic synthetic parameters (PyTorch layouts).
    w1 = 0.1 * jax.random.normal(ks[1], (256, Cin, 3, 3), dtype=jnp.float32)
    b1 = 0.1 * jax.random.normal(ks[2], (256,), dtype=jnp.float32)
    gamma = 1.0 + 0.1 * jax.random.normal(ks[3], (256,), dtype=jnp.float32)
    beta = 0.1 * jax.random.normal(ks[4], (256,), dtype=jnp.float32)
    rmean = 0.1 * jax.random.normal(ks[5], (256,), dtype=jnp.float32)
    rvar = jax.random.uniform(ks[6], (256,), minval=0.5, maxval=1.5,
                              dtype=jnp.float32)
    w2 = 0.1 * jax.random.normal(ks[7], (num_classes, 256, 1, 1),
                                 dtype=jnp.float32)
    b2 = 0.1 * jax.random.normal(ks[8], (num_classes,), dtype=jnp.float32)

    # Kernel path (NHWC layout).
    x_nhwc = jnp.transpose(x_nchw, (0, 2, 3, 1))
    out_nhwc = fused_head_forward(x_nhwc, w1, b1, gamma, beta, rmean, rvar,
                                  w2, b2)
    out_nhwc = jax.block_until_ready(out_nhwc)

    # Reference check (NCHW f32, like PyTorch).  The kernel runs bf16 matmuls
    # (f32 accumulation) and stores a bf16 slab, so tolerance is bf16-level.
    ref_nchw = reference_forward(x_nchw, w1, b1, gamma, beta, rmean, rvar,
                                 w2, b2)
    out_nchw = jnp.transpose(out_nhwc, (0, 3, 1, 2))
    assert out_nchw.shape == (N, num_classes, H, W)
    max_err = float(jnp.max(jnp.abs(out_nchw - ref_nchw)))
    assert jnp.allclose(out_nchw, ref_nchw, atol=5e-2, rtol=5e-2), max_err

    print("KERNEL_OK")
</pallas_src>

<mosaic_0001>
module attributes {stable_mosaic.version = 11 : i64} {
  func.func @fused_head_kernel(%arg0: i32, %arg1: i32, %arg2: memref<1x1x160x24xbf16, #tpu.memory_space<vmem>>, %arg3: memref<3x24x256xbf16, #tpu.memory_space<vmem>>, %arg4: memref<1x256xf32, #tpu.memory_space<vmem>>, %arg5: memref<256x128xbf16, #tpu.memory_space<vmem>>, %arg6: memref<1x128xf32, #tpu.memory_space<vmem>>, %arg7: memref<1x128x128xbf16, #tpu.memory_space<vmem>>) attributes {dimension_semantics = [#tpu.dimension_semantics<parallel>, #tpu.dimension_semantics<parallel>], iteration_bounds = array<i64: 2, 2>, scalar_prefetch = 0 : i64, scratch_operands = 0 : i64, tpu.core_type = #tpu.core_type<tc>, window_params = [{transform_indices = @transform_0, window_bounds = array<i64: 1, 1, 160, 24>}, {pipeline_mode = #tpu.pipeline_mode<synchronous>, transform_indices = @transform_1, window_bounds = array<i64: 3, 24, 256>}, {pipeline_mode = #tpu.pipeline_mode<synchronous>, transform_indices = @transform_2, window_bounds = array<i64: 1, 256>}, {pipeline_mode = #tpu.pipeline_mode<synchronous>, transform_indices = @transform_3, window_bounds = array<i64: 256, 128>}, {pipeline_mode = #tpu.pipeline_mode<synchronous>, transform_indices = @transform_4, window_bounds = array<i64: 1, 128>}, {transform_indices = @transform_5, window_bounds = array<i64: 1, 128, 128>}]} {
    %c0 = arith.constant 0 : index
    %c0_0 = arith.constant 0 : index
    %c0_1 = arith.constant 0 : index
    %c0_2 = arith.constant 0 : index
    %0 = vector.load %arg2[%c0, %c0_0, %c0_1, %c0_2] : memref<1x1x160x24xbf16, #tpu.memory_space<vmem>>, vector<1x1x128x24xbf16>
    %1 = vector.shape_cast %0 : vector<1x1x128x24xbf16> to vector<128x24xbf16>
    %c0_3 = arith.constant 0 : index
    %c0_4 = arith.constant 0 : index
    %c0_5 = arith.constant 0 : index
    %2 = vector.load %arg3[%c0_3, %c0_4, %c0_5] : memref<3x24x256xbf16, #tpu.memory_space<vmem>>, vector<1x24x256xbf16>
    %3 = vector.shape_cast %2 : vector<1x24x256xbf16> to vector<24x256xbf16>
    %cst = arith.constant dense<0.000000e+00> : vector<128x256xf32>
    %4 = tpu.matmul %1, %3, %cst {dimension_numbers = #tpu.dot_dimension_numbers<[1], [0], [0], [1], [0, 0, 1, 1], [], []>} : vector<128x24xbf16>, vector<24x256xbf16>, vector<128x256xf32> -> vector<128x256xf32>
    %c0_6 = arith.constant 0 : index
    %c0_7 = arith.constant 0 : index
    %c16 = arith.constant 16 : index
    %c0_8 = arith.constant 0 : index
    %5 = vector.load %arg2[%c0_6, %c0_7, %c16, %c0_8] : memref<1x1x160x24xbf16, #tpu.memory_space<vmem>>, vector<1x1x128x24xbf16>
    %6 = vector.shape_cast %5 : vector<1x1x128x24xbf16> to vector<128x24xbf16>
    %c1 = arith.constant 1 : index
    %c0_9 = arith.constant 0 : index
    %c0_10 = arith.constant 0 : index
    %7 = vector.load %arg3[%c1, %c0_9, %c0_10] : memref<3x24x256xbf16, #tpu.memory_space<vmem>>, vector<1x24x256xbf16>
    %8 = vector.shape_cast %7 : vector<1x24x256xbf16> to vector<24x256xbf16>
    %cst_11 = arith.constant dense<0.000000e+00> : vector<128x256xf32>
    %9 = tpu.matmul %6, %8, %cst_11 {dimension_numbers = #tpu.dot_dimension_numbers<[1], [0], [0], [1], [0, 0, 1, 1], [], []>} : vector<128x24xbf16>, vector<24x256xbf16>, vector<128x256xf32> -> vector<128x256xf32>
    %10 = arith.addf %4, %9 : vector<128x256xf32>
    %c0_12 = arith.constant 0 : index
    %c0_13 = arith.constant 0 : index
    %c32 = arith.constant 32 : index
    %c0_14 = arith.constant 0 : index
    %11 = vector.load %arg2[%c0_12, %c0_13, %c32, %c0_14] : memref<1x1x160x24xbf16, #tpu.memory_space<vmem>>, vector<1x1x128x24xbf16>
    %12 = vector.shape_cast %11 : vector<1x1x128x24xbf16> to vector<128x24xbf16>
    %c2 = arith.constant 2 : index
    %c0_15 = arith.constant 0 : index
    %c0_16 = arith.constant 0 : index
    %13 = vector.load %arg3[%c2, %c0_15, %c0_16] : memref<3x24x256xbf16, #tpu.memory_space<vmem>>, vector<1x24x256xbf16>
    %14 = vector.shape_cast %13 : vector<1x24x256xbf16> to vector<24x256xbf16>
    %cst_17 = arith.constant dense<0.000000e+00> : vector<128x256xf32>
    %15 = tpu.matmul %12, %14, %cst_17 {dimension_numbers = #tpu.dot_dimension_numbers<[1], [0], [0], [1], [0, 0, 1, 1], [], []>} : vector<128x24xbf16>, vector<24x256xbf16>, vector<128x256xf32> -> vector<128x256xf32>
    %16 = arith.addf %10, %15 : vector<128x256xf32>
    %c0_18 = arith.constant 0 : index
    %c0_19 = arith.constant 0 : index
    %17 = vector.load %arg4[%c0_18, %c0_19] : memref<1x256xf32, #tpu.memory_space<vmem>>, vector<1x256xf32>
    %18 = vector.broadcast %17 : vector<1x256xf32> to vector<128x256xf32>
    %19 = arith.addf %16, %18 : vector<128x256xf32>
    %cst_20 = arith.constant 0.000000e+00 : f32
    %20 = vector.broadcast %cst_20 : f32 to vector<128x256xf32>
    %21 = arith.maximumf %19, %20 : vector<128x256xf32>
    %22 = arith.truncf %21 : vector<128x256xf32> to vector<128x256xbf16>
    %c0_21 = arith.constant 0 : index
    %c0_22 = arith.constant 0 : index
    %23 = vector.load %arg5[%c0_21, %c0_22] : memref<256x128xbf16, #tpu.memory_space<vmem>>, vector<256x128xbf16>
    %cst_23 = arith.constant dense<0.000000e+00> : vector<128x128xf32>
    %24 = tpu.matmul %22, %23, %cst_23 {dimension_numbers = #tpu.dot_dimension_numbers<[1], [0], [0], [1], [0, 0, 1, 1], [], []>} : vector<128x256xbf16>, vector<256x128xbf16>, vector<128x128xf32> -> vector<128x128xf32>
    %c0_24 = arith.constant 0 : index
    %c0_25 = arith.constant 0 : index
    %25 = vector.load %arg6[%c0_24, %c0_25] : memref<1x128xf32, #tpu.memory_space<vmem>>, vector<1x128xf32>
    %26 = vector.broadcast %25 : vector<1x128xf32> to vector<128x128xf32>
    %27 = arith.addf %24, %26 : vector<128x128xf32>
    %28 = arith.truncf %27 : vector<128x128xf32> to vector<128x128xbf16>
    %c0_26 = arith.constant 0 : index
    %c0_27 = arith.constant 0 : index
    %c0_28 = arith.constant 0 : index
    %29 = vector.load %arg7[%c0_26, %c0_27, %c0_28] : memref<1x128x128xbf16, #tpu.memory_space<vmem>>, vector<1x128x128xbf16>
    %30 = vector.shape_cast %29 : vector<1x128x128xbf16> to vector<128x128xbf16>
    %31 = vector.shape_cast %28 : vector<128x128xbf16> to vector<1x128x128xbf16>
    tpu.vector_store %arg7[%c0_26, %c0_27, %c0_28], %31 {strides = array<i32>} : memref<1x128x128xbf16, #tpu.memory_space<vmem>>, vector<1x128x128xbf16>,
    return
  }
  func.func @transform_0(%arg0: i32, %arg1: i32) -> (i32, i32, i32, i32) {
    %c0_i32 = arith.constant 0 : i32
    %c0_i32_0 = arith.constant 0 : i32
    %c0_i32_1 = arith.constant 0 : i32
    return %arg0, %arg1, %c0_i32, %c0_i32_0 : i32, i32, i32, i32
  }
  func.func @transform_1(%arg0: i32, %arg1: i32) -> (i32, i32, i32) {
    %c0_i32 = arith.constant 0 : i32
    %c0_i32_0 = arith.constant 0 : i32
    %c0_i32_1 = arith.constant 0 : i32
    %c0_i32_2 = arith.constant 0 : i32
    return %c0_i32, %c0_i32_0, %c0_i32_1 : i32, i32, i32
  }
  func.func @transform_2(%arg0: i32, %arg1: i32) -> (i32, i32) {
    %c0_i32 = arith.constant 0 : i32
    %c0_i32_0 = arith.constant 0 : i32
    %c0_i32_1 = arith.constant 0 : i32
    return %c0_i32, %c0_i32_0 : i32, i32
  }
  func.func @transform_3(%arg0: i32, %arg1: i32) -> (i32, i32) {
    %c0_i32 = arith.constant 0 : i32
    %c0_i32_0 = arith.constant 0 : i32
    %c0_i32_1 = arith.constant 0 : i32
    return %c0_i32, %c0_i32_0 : i32, i32
  }
  func.func @transform_4(%arg0: i32, %arg1: i32) -> (i32, i32) {
    %c0_i32 = arith.constant 0 : i32
    %c0_i32_0 = arith.constant 0 : i32
    %c0_i32_1 = arith.constant 0 : i32
    return %c0_i32, %c0_i32_0 : i32, i32
  }
  func.func @transform_5(%arg0: i32, %arg1: i32) -> (i32, i32, i32) {
    %c0_i32 = arith.constant 0 : i32
    %c0_i32_0 = arith.constant 0 : i32
    return %arg0, %arg1, %c0_i32 : i32, i32, i32
  }
}

</mosaic_0001>

<bundles_post_ra>
// kernel: tpu_custom_call.1
= control target key start
LH: loop header
LB: loop body
LE: loop exit
PB: predicated region body
PF: predicated region fallthrough
CT: control target
= control target key end

     0   :  { %10 = vsyncpa [#allocation3], 0  ;;  %s2250_s0 = inlined_call_operand.vmem [shape: bf16[2,2,160,24], index: 0, kind: input, shape index: {}]   ;;  %s2251_s1 = inlined_call_operand.vmem [shape: bf16[3,24,256], index: 1, kind: input, shape index: {}]   ;;  %s2252_s2 = inlined_call_operand.vmem [shape: f32[1,256], index: 2, kind: input, shape index: {}]   ;;  %s2253_s3 = inlined_call_operand.vmem [shape: bf16[256,128], index: 3, kind: input, shape index: {}]   ;;  %s2254_s4 = inlined_call_operand.vmem [shape: f32[1,128], index: 4, kind: input, shape index: {}]   ;;  %s2255_s5 = inlined_call_operand.hbm [shape: bf16[2,256,128], index: 5, kind: output, shape index: {}]  }
   0x1   :  { %12 = vsyncpa [#allocation3 + $0x1], 0  ;;  %s1789_s18 = smov 0   ;;  %s1791_s19 = smov 0  }
   0x2   :  { %s1793_s20 = smov 0   ;;  %s1795_s21 = smov 0  }
   0x3   :  { %s1797_s22 = smov 0   ;;  %s1799_s23 = smov 0  }
   0x4   :  { %s1801_s24 = smov 0   ;;  %s1803_s25 = smov 0  }
   0x5 LB: > { %s1276_s26 = sadd.s32 4294967295, %s1755_s25   ;;  %s1277_s27 = sadd.s32 4294967294, %s1755_s25   ;;  %s1755_s25 = sphi %s1803_s25, %s18_s25   ;;  %s1751_s24 = sphi %s1801_s24, %s2264_s24   ;;  %s1747_s23 = sphi %s1799_s23, %s2263_s23   ;;  %s1743_s22 = sphi %s1797_s22, %s2262_s22   ;;  %s1739_s21 = sphi %s1795_s21, %s2261_s21   ;;  %s1735_s20 = sphi %s1793_s20, %s2260_s20   ;;  %s1731_s19 = sphi %s1791_s19, %s2259_s19   ;;  %s1727_s18 = sphi %s1789_s18, %s2258_s18  }
   0x6   : > { %s27_s28 = sadd.s32 1, %s1747_s23  ;;  %s30_s29 = sadd.s32 1, %s1751_s24 }
   0x7   : > { %p28_p0 = scmp.ge.s32.totalorder %s27_s28, 2  ;;  %p161_p1 = scmp.ne.s32.totalorder %s1735_s20, %s1731_s19 }
   0x8   : > { %p162_p2 = scmp.eq.s32.totalorder %s1276_s26, 3  ;;  %p167_p5 = scmp.ne.s32.totalorder %s1731_s19, %s1727_s18 }
   0x9   : > { %s2266_s28 = smov (%p28_p0, %s27_s28), 0  ;;  %s2268_s29 = smov (!%p28_p0, %s30_s29), %s1751_s24 }
   0xa   : > { %s147_s30 = ssub.s32 %s1747_s23, %s2266_s28  ;;  %p1840_p3 = por %p162_p2, %p161_p1 }
   0xb   : > { %p32_p4 = scmp.ge.s32.totalorder %s2268_s29, 2  ;;  %p168_p6 = scmp.eq.s32.totalorder %s1277_s27, 3 }
   0xc   : > { %p1280_p7 = scmp.ge.s32.totalorder %s1755_s25, 1  ;;  %p210_p9 = scmp.lt.s32.totalorder %s1755_s25, 5 }
   0xd   : > { %s2270_s29 = smov (%p32_p4, %s2268_s29), 0  ;;  %p1849_p8 = por %p168_p6, %p167_p5 }
   0xe   : > { %s146_s8 = ssub.s32 %s1751_s24, %s2270_s29  ;;  %s151_s9 = sadd.s32 1, %s1735_s20 }
   0xf   : > { %s148_s10 = sor.u32 %s147_s30, %s146_s8  ;;  %p211_p10 = pnand %p1280_p7, %p210_p9 }
  0x10   : > { %p149_p11 = scmp.eq.s32.totalorder %s148_s10, 0  ;;  %p242_p12 = scmp.lt.s32.totalorder (!%p211_p10), %s1743_s22, 1 }
  0x11   : > { %214 = sbr.rel (%p211_p10) target bundleno = 567 (0x237), region = 40  ;;  %p244_p13 = scmp.lt.s32.totalorder (!%p211_p10), %s1739_s21, 1 }
  0x12   : > { %s1858_s11 = scalar_select %p149_p11, %s1735_s20, %s151_s9  }
  0x13   : > { %s239_s17 = sand.u32 (!%p211_p10), 1, %s1731_s19   ;;  %s1494_s8 = sshll.u32 (!%p211_p10), %s1739_s21, 4 }
  0x14   : > { %s1281_s27 = sshll.u32 (!%p211_p10), %s239_s17, 6  ;;  %s1495_s9 = sshll.u32 (!%p211_p10), %s1743_s22, 5 }
  0x15   : > { %s2180_s30 = scalar_lea.vmem (!%p211_p10), [#allocation2], %s1281_s27 }
  0x16   : > { %v1285_v0 = vld [vmem:[%s2251_s1 + $0x28] sm:$0xff]  ;;  %vm358_vm0 = vcmask 1043456   ;;  %v271_v1 = vld [vmem:[%s2251_s1 + $0x10] sm:$0xff]  ;;  %v1320_v6 = vld [vmem:[%s2251_s1 + $0x18] sm:$0xf]  ;;  %s243_s16 = scalar_select %p242_p12, %s1743_s22, 1 }
  0x17   : > { %v325_v2 = vunpack.c.l.b16 %v1285_v0  ;;  %v326_v3 = vunpack.c.h.b16 %v1285_v0  ;;  %v475_v4 = vunpack.c.l.b16 %v271_v1  ;;  %v476_v5 = vunpack.c.h.b16 %v271_v1  ;;  %v1511_v7 = vld [vmem:[%s2251_s1 + $0x1c] sm:$0xf0]  ;;  %v1510_v8 = vld [vmem:[%s2251_s1 + $0x1c] sm:$0xf]  ;;  %v1322_v9 = vld [vmem:[%s2251_s1 + $0x20] sm:$0xf0] }
  0x18   : > { %v1348_v10 = vld [vmem:[%s2251_s1] sm:$0xf]  ;;  %v1508_v15 = vld [vmem:[%s2251_s1 + $0x4] sm:$0xf0]  ;;  %v1507_v17 = vld [vmem:[%s2251_s1 + $0x4] sm:$0xf]  ;;  %v1321_v24 = vor.u32 %v1511_v7, %v1320_v6  ;;  %v1325_v25 = vor.u32 %v1510_v8, %v1322_v9 }
  0x19   : > { %v329_v11 = vpack.c.b16 %v325_v2, %v325_v2  ;;  %v330_v12 = vpack.c.b16 %v326_v3, %v326_v3  ;;  %v479_v13 = vpack.c.b16 %v475_v4, %v475_v4  ;;  %v480_v14 = vpack.c.b16 %v476_v5, %v476_v5  ;;  %v1372_v16 = vld [vmem:[%s2251_s1 + $0x40] sm:$0xff]  ;;  %v1350_v18 = vld [vmem:[%s2251_s1 + $0x8] sm:$0xf0]  ;;  %s1586_s10 = smul.u32 40, %s243_s16  ;;  %v1407_v37 = vld [vmem:[%s2251_s1 + $0x30] sm:$0xf] }
  0x1a   : > { %v657_v19 = vunpack.c.l.b16 %v1372_v16  ;;  %s245_s12 = scalar_select %p244_p13, %s1739_s21, 1  ;;  %v658_v27 = vunpack.c.h.b16 %v1372_v16  ;;  %v1349_v28 = vor.u32 %v1508_v15, %v1348_v10  ;;  %v1353_v29 = vor.u32 %v1507_v17, %v1350_v18  ;;  %v1521_v38 = vld [vmem:[%s2251_s1 + $0x34] sm:$0xf0]  ;;  %v1520_v39 = vld [vmem:[%s2251_s1 + $0x34] sm:$0xf]  ;;  %v1527_v60 = vld [vmem:[%s2253_s3 + $0x28] sm:$0xff] }
  0x1b   : > { %v360_v20 = vsel %vm358_vm0, %v329_v11, 0  ;;  %v363_v21 = vsel %vm358_vm0, %v330_v12, 0  ;;  %v487_v22 = vsel %vm358_vm0, %v479_v13, 0  ;;  %v490_v23 = vsel %vm358_vm0, %v480_v14, 0  ;;  %v1409_v41 = vld [vmem:[%s2251_s1 + $0x38] sm:$0xf0] }
  0x1c   : > { %371 = vmatpush.bf16.msra.mxu0 %v360_v20  ;;  %420 = vmatpush.bf16.msra.mxu1 %v363_v21  ;;  %v661_v26 = vpack.c.b16 %v657_v19, %v657_v19  ;;  %s1585_s13 = smul.u32 20, %s245_s12  ;;  %v662_v30 = vpack.c.b16 %v658_v27, %v658_v27  ;;  %vm333_vm1 = vcmask 195584   ;;  %v1408_v40 = vor.u32 %v1521_v38, %v1407_v37  ;;  %v1529_v48 = vld [vmem:[%s2253_s3 + $0x38] sm:$0xff]  ;;  %v1528_v53 = vld [vmem:[%s2253_s3 + $0x30] sm:$0xff]  ;;  %v1535_v61 = vld [vmem:[%s2253_s3 + $0x68] sm:$0xff]  ;;  %s1174_s22 = scalar_lea.sflag [#allocation3], %s239_s17 }
  0x1d   : > { %498 = vmatpush.bf16.msra.mxu2 %v487_v22  ;;  %547 = vmatpush.bf16.msra.mxu3 %v490_v23  ;;  %v1412_v42 = vor.u32 %v1520_v39, %v1409_v41  ;;  %v1537_v49 = vld [vmem:[%s2253_s3 + $0x78] sm:$0xff]  ;;  %v1536_v54 = vld [vmem:[%s2253_s3 + $0x70] sm:$0xff]  ;;  %v1526_v3 = vld [vmem:[%s2253_s3 + $0x20] sm:$0xff] }
  0x1e   : > { %v690_v31 = vsel %vm358_vm0, %v661_v26, 0  ;;  %s248_s14 = sadd.s32 %s1586_s10, %s1585_s13  ;;  %v693_v32 = vsel %vm358_vm0, %v662_v30, 0  ;;  %v1534_v4 = vld [vmem:[%s2253_s3 + $0x60] sm:$0xff]  ;;  %v1525_v10 = vld [vmem:[%s2253_s3 + $0x18] sm:$0xff]  ;;  %v1524_v17 = vld [vmem:[%s2253_s3 + $0x10] sm:$0xff]  ;;  %s1185_s10 = sadd.s32 %s1495_s9, %s1494_s8 }
  0x1f   : > { %s1282_s15 = sshll.u32 %s248_s14, 2  ;;  %v1533_v11 = vld [vmem:[%s2253_s3 + $0x58] sm:$0xff]  ;;  %v1532_v18 = vld [vmem:[%s2253_s3 + $0x50] sm:$0xff]  ;;  %s1496_s12 = sshll.u32 %s1185_s10, 2 }
  0x20   : > { %372 = vmatpush.bf16.msra.mxu0 %v1321_v24  ;;  %421 = vmatpush.bf16.msra.mxu1 %v1325_v25  ;;  %s1908_s26 = scalar_lea.vmem %s2250_s0, %s1282_s15  ;;  %v1523_v24 = vld [vmem:[%s2253_s3 + $0x8] sm:$0xff]  ;;  %s1188_s15 = sshll.u32 %s2180_s30, 4  ;;  %s1189_s15 = int_to_ptr.vmem [resolvable:$true] %s1188_s15 }
  0x21   : > { %499 = vmatpush.bf16.msra.mxu2 %v1349_v28  ;;  %548 = vmatpush.bf16.msra.mxu3 %v1353_v29  ;;  %v1500_v33 = vld [vmem:[%s1908_s26 + $0x8] sm:$0xff]  ;;  %v1499_v34 = vld [vmem:[%s1908_s26] sm:$0xff]  ;;  %v1501_v35 = vld [vmem:[%s1908_s26 + $0x10] sm:$0xff]  ;;  %s1681_s10 = scalar_lea.hbm %s2255_s5, 256 }
  0x22   : > { %v1502_v36 = vld [vmem:[%s1908_s26 + $0x18] sm:$0xff]  ;;  %v1503_v43 = vld [vmem:[%s1908_s26 + $0x20] sm:$0xff]  ;;  %v1504_v44 = vld [vmem:[%s1908_s26 + $0x28] sm:$0xff] }
  0x23   : > { %1326 = vmatmul.msk.bf16.vlgmr.msra.gmra.mxu0 %vm333_vm1, %v1500_v33  ;;  %1334 = vmatmul.msk.bf16.vlgmr.msra.gmra.mxu1 %vm333_vm1, %v1500_v33  ;;  %v1505_v45 = vld [vmem:[%s1908_s26 + $0x30] sm:$0xff]  ;;  %v1506_v46 = vld [vmem:[%s1908_s26 + $0x38] sm:$0xff]  ;;  %v1509_v47 = vld [vmem:[%s1908_s26 + $0x40] sm:$0xff] }
  0x24   : > { %701 = vmatpush.bf16.msrb.mxu0 %v690_v31  ;;  %750 = vmatpush.bf16.msrb.mxu1 %v693_v32  ;;  %v1512_v50 = vld [vmem:[%s1908_s26 + $0x10] sm:$0xff]  ;;  %v1513_v57 = vld [vmem:[%s1908_s26 + $0x18] sm:$0xff]  ;;  %v1514_v0 = vld [vmem:[%s1908_s26 + $0x20] sm:$0xff] }
  0x25   : > { %1354 = vmatmul.msk.bf16.vlgmr.msra.gmra.mxu2 %vm333_vm1, %v1499_v34  ;;  %1362 = vmatmul.msk.bf16.vlgmr.msra.gmra.mxu3 %vm333_vm1, %v1499_v34  ;;  %v1515_v7 = vld [vmem:[%s1908_s26 + $0x28] sm:$0xff]  ;;  %v1516_v14 = vld [vmem:[%s1908_s26 + $0x30] sm:$0xff]  ;;  %v1517_v21 = vld [vmem:[%s1908_s26 + $0x38] sm:$0xff] }
  0x26   : > { %1043 = vmatpush.bf16.msrb.mxu2 %v1529_v48  ;;  %1092 = vmatpush.bf16.msrb.mxu3 %v1537_v49  ;;  %v1531_v25 = vld [vmem:[%s2253_s3 + $0x48] sm:$0xff]  ;;  %v1518_v30 = vld [vmem:[%s1908_s26 + $0x40] sm:$0xff] }
  0x27   : > { %v1530_v34 = vld [vmem:[%s2253_s3 + $0x40] sm:$0xff]  ;;  %v1519_v39 = vld [vmem:[%s1908_s26 + $0x48] sm:$0xff]  ;;  %s1187_s26 = scalar_lea.hbm %s2255_s5, %s1496_s12 }
  0x28   : > { %702 = vmatpush.bf16.msrb.mxu0 %v1408_v40  ;;  %751 = vmatpush.bf16.msrb.mxu1 %v1412_v42  ;;  %s1190_s21 = sshll.u32 %s1187_s26, 4  ;;  %s1191_s21 = int_to_ptr.hbm [resolvable:$true] %s1190_s21 }
  0x29   : > { %s1675_s16 = sshra.s32 %s1191_s21, 4  ;;  %s1676_s16 = int_to_ptr.hbm [resolvable:$true] %s1675_s16 }
  0x2a   : > { %1044 = vmatpush.bf16.msrb.mxu2 %v1528_v53  ;;  %1093 = vmatpush.bf16.msrb.mxu3 %v1536_v54  ;;  %s1677_s27 = scalar_lea.hbm %s1676_s16, 64  ;;  %p1682_p4 = scmp.lt.s32.totalorder %s1676_s16, %s2255_s5 }
  0x2b   : > { %p1678_p0 = scmp.ne.s32.totalorder %s1676_s16, %s1677_s27  ;;  %p1683_p5 = scmp.lt.s32.totalorder %s1681_s10, %s1677_s27 }
  0x2d   : > { %p1679_p1 = pnand %p1678_p0, %p1840_p3  ;;  %p1684_p6 = por %p1683_p5, %p1682_p4 }
  0x2e   : > { %1045 = vmatpush.bf16.msrb.mxu2 %v1527_v60  ;;  %1094 = vmatpush.bf16.msrb.mxu3 %v1535_v61 }
  0x2f   : > { %p1680_p2 = pneg %p1679_p1 }
  0x31   : > { %p1685_p7 = pnand %p1684_p6, %p1680_p2 }
  0x32   : > { %1046 = vmatpush.bf16.msrb.mxu2 %v1526_v3  ;;  %1095 = vmatpush.bf16.msrb.mxu3 %v1534_v4 }
  0x33   : > { %1327 = vmatmul.msk.bf16.gmra.mxu0 %vm333_vm1, %v1501_v35  ;;  %1335 = vmatmul.msk.bf16.gmra.mxu1 %vm333_vm1, %v1501_v35 }
  0x35   : > { %1355 = vmatmul.msk.bf16.gmra.mxu2 %vm333_vm1, %v1500_v33  ;;  %1363 = vmatmul.msk.bf16.gmra.mxu3 %vm333_vm1, %v1500_v33  ;;  %v1522_v33 = vld [vmem:[%s2253_s3] sm:$0xff] }
  0x36   : > { %1047 = vmatpush.bf16.msrb.mxu2 %v1525_v10  ;;  %1096 = vmatpush.bf16.msrb.mxu3 %v1533_v11 }
  0x3a   : > { %1048 = vmatpush.bf16.msrb.mxu2 %v1524_v17  ;;  %1097 = vmatpush.bf16.msrb.mxu3 %v1532_v18 }
  0x3e   : > { %1049 = vmatpush.bf16.msrb.mxu2 %v1523_v24  ;;  %1098 = vmatpush.bf16.msrb.mxu3 %v1531_v25 }
  0x42   : > { %1050 = vmatpush.bf16.msrb.mxu2 %v1522_v33  ;;  %1099 = vmatpush.bf16.msrb.mxu3 %v1530_v34 }
  0x43   : > { %1328 = vmatmul.msk.bf16.gmra.mxu0 %vm333_vm1, %v1502_v36  ;;  %1336 = vmatmul.msk.bf16.gmra.mxu1 %vm333_vm1, %v1502_v36 }
  0x45   : > { %1356 = vmatmul.msk.bf16.gmra.mxu2 %vm333_vm1, %v1501_v35  ;;  %1364 = vmatmul.msk.bf16.gmra.mxu3 %vm333_vm1, %v1501_v35 }
  0x53   : > { %1329 = vmatmul.msk.bf16.gmra.mxu0 %vm333_vm1, %v1503_v43  ;;  %1337 = vmatmul.msk.bf16.gmra.mxu1 %vm333_vm1, %v1503_v43 }
  0x55   : > { %1357 = vmatmul.msk.bf16.gmra.mxu2 %vm333_vm1, %v1502_v36  ;;  %1365 = vmatmul.msk.bf16.gmra.mxu3 %vm333_vm1, %v1502_v36 }
  0x63   : > { %1330 = vmatmul.msk.bf16.gmra.mxu0 %vm333_vm1, %v1504_v44  ;;  %1338 = vmatmul.msk.bf16.gmra.mxu1 %vm333_vm1, %v1504_v44 }
  0x65   : > { %1358 = vmatmul.msk.bf16.gmra.mxu2 %vm333_vm1, %v1503_v43  ;;  %1366 = vmatmul.msk.bf16.gmra.mxu3 %vm333_vm1, %v1503_v43 }
  0x73   : > { %1331 = vmatmul.msk.bf16.gmra.mxu0 %vm333_vm1, %v1505_v45  ;;  %1339 = vmatmul.msk.bf16.gmra.mxu1 %vm333_vm1, %v1505_v45 }
  0x75   : > { %1359 = vmatmul.msk.bf16.gmra.mxu2 %vm333_vm1, %v1504_v44  ;;  %1367 = vmatmul.msk.bf16.gmra.mxu3 %vm333_vm1, %v1504_v44 }
  0x83   : > { %1332 = vmatmul.msk.bf16.gmra.mxu0 %vm333_vm1, %v1506_v46  ;;  %1340 = vmatmul.msk.bf16.gmra.mxu1 %vm333_vm1, %v1506_v46 }
  0x85   : > { %1360 = vmatmul.msk.bf16.gmra.mxu2 %vm333_vm1, %v1505_v45  ;;  %1368 = vmatmul.msk.bf16.gmra.mxu3 %vm333_vm1, %v1505_v45 }
  0x93   : > { %1333 = vmatmul.msk.bf16.gmra.mxu0 %vm333_vm1, %v1509_v47  ;;  %1341 = vmatmul.msk.bf16.gmra.mxu1 %vm333_vm1, %v1509_v47 }
  0x95   : > { %1361 = vmatmul.msk.bf16.gmra.mxu2 %vm333_vm1, %v1506_v46  ;;  %1369 = vmatmul.msk.bf16.gmra.mxu3 %vm333_vm1, %v1506_v46 }
  0xa0   : > { %v1970_v51 = vpop.f32.mrf.mxu0  ;;  %v1972_v52 = vpop.f32.mrf.mxu1 }
  0xa3   : > { %1413 = vmatmul.msk.bf16.vlgmr.msrb.gmra.mxu0 %vm333_vm1, %v1512_v50  ;;  %1421 = vmatmul.msk.bf16.vlgmr.msrb.gmra.mxu1 %vm333_vm1, %v1512_v50  ;;  %v825_v50 = vld [vmem:[%s2252_s2] sm:$0x3] }
  0xa4   : > { %v2106_v4 = vperm.slane %v825_v50, 1 }
  0xa8   : > { %v1982_v55 = vpop.f32.mrf.mxu0  ;;  %v1984_v56 = vpop.f32.mrf.mxu1 }
  0xa9   : > { %v501_v28 = vpop.f32.mrf.mxu2  ;;  %v550_v29 = vpop.f32.mrf.mxu3 }
  0xaa   : > { %v502_v53 = vadd.f32 %v501_v28, %v1970_v51  ;;  %v551_v54 = vadd.f32 %v550_v29, %v1972_v52 }
  0xb0   : > { %v1987_v58 = vpop.f32.mrf.mxu0  ;;  %v1989_v59 = vpop.f32.mrf.mxu1 }
  0xb1   : > { %v503_v35 = vpop.f32.mrf.mxu2  ;;  %v552_v36 = vpop.f32.mrf.mxu3 }
  0xb2   : > { %v553_v10 = vadd.f32 %v552_v36, %v1984_v56 }
  0xb3   : > { %1414 = vmatmul.msk.bf16.gmra.mxu0 %vm333_vm1, %v1513_v57  ;;  %1422 = vmatmul.msk.bf16.gmra.mxu1 %vm333_vm1, %v1513_v57 }
  0xb8   : > { %v1999_v62 = vpop.f32.mrf.mxu0  ;;  %v2001_v63 = vpop.f32.mrf.mxu1 }
  0xb9   : > { %v506_v42 = vpop.f32.mrf.mxu2  ;;  %v555_v43 = vpop.f32.mrf.mxu3 }
  0xc0   : > { %v2004_v1 = vpop.f32.mrf.mxu0  ;;  %v2006_v2 = vpop.f32.mrf.mxu1 }
  0xc1   : > { %v508_v46 = vpop.f32.mrf.mxu2  ;;  %v557_v47 = vpop.f32.mrf.mxu3 }
  0xc3   : > { %1415 = vmatmul.msk.bf16.gmra.mxu0 %vm333_vm1, %v1514_v0  ;;  %1423 = vmatmul.msk.bf16.gmra.mxu1 %vm333_vm1, %v1514_v0  ;;  %v2104_v0 = vperm.slane %v825_v50, 0 }
  0xc8   : > { %v2016_v5 = vpop.f32.mrf.mxu0  ;;  %v2018_v6 = vpop.f32.mrf.mxu1 }
  0xc9   : > { %v511_v57 = vpop.f32.mrf.mxu2  ;;  %v560_v60 = vpop.f32.mrf.mxu3 }
  0xd0   : > { %v2021_v8 = vpop.f32.mrf.mxu0  ;;  %v2023_v9 = vpop.f32.mrf.mxu1 }
  0xd1   : > { %v513_v33 = vpop.f32.mrf.mxu2 }
  0xd3   : > { %1416 = vmatmul.msk.bf16.gmra.mxu0 %vm333_vm1, %v1515_v7  ;;  %1424 = vmatmul.msk.bf16.gmra.mxu1 %vm333_vm1, %v1515_v7  ;;  %v504_v7 = vadd.f32 %v503_v35, %v1982_v55  ;;  %v562_v55 = vpop.f32.mrf.mxu3 }
  0xd8   : > { %v2033_v12 = vpop.f32.mrf.mxu0  ;;  %v2035_v13 = vpop.f32.mrf.mxu1 }
  0xe0   : > { %v2038_v15 = vpop.f32.mrf.mxu0  ;;  %v2040_v16 = vpop.f32.mrf.mxu1 }
  0xe3   : > { %1417 = vmatmul.msk.bf16.gmra.mxu0 %vm333_vm1, %v1516_v14  ;;  %1425 = vmatmul.msk.bf16.gmra.mxu1 %vm333_vm1, %v1516_v14 }
  0xe8   : > { %v2050_v19 = vpop.f32.mrf.mxu0  ;;  %v2052_v20 = vpop.f32.mrf.mxu1 }
  0xf0   : > { %v2055_v22 = vpop.f32.mrf.mxu0  ;;  %v2057_v23 = vpop.f32.mrf.mxu1 }
  0xf3   : > { %1418 = vmatmul.msk.bf16.gmra.mxu0 %vm333_vm1, %v1517_v21  ;;  %1426 = vmatmul.msk.bf16.gmra.mxu1 %vm333_vm1, %v1517_v21 }
  0xf8   : > { %v2067_v26 = vpop.f32.mrf.mxu0  ;;  %v2069_v27 = vpop.f32.mrf.mxu1 }
 0x100   : > { %v2072_v31 = vpop.f32.mrf.mxu0  ;;  %v2074_v32 = vpop.f32.mrf.mxu1 }
 0x103   : > { %1419 = vmatmul.msk.bf16.gmra.mxu0 %vm333_vm1, %v1518_v30  ;;  %1427 = vmatmul.msk.bf16.gmra.mxu1 %vm333_vm1, %v1518_v30 }
 0x108   : > { %v2084_v37 = vpop.f32.mrf.mxu0  ;;  %v2086_v38 = vpop.f32.mrf.mxu1 }
 0x110   : > { %v2089_v40 = vpop.f32.mrf.mxu0  ;;  %v2091_v41 = vpop.f32.mrf.mxu1 }
 0x113   : > { %1420 = vmatmul.msk.bf16.gmra.mxu0 %vm333_vm1, %v1519_v39  ;;  %1428 = vmatmul.msk.bf16.gmra.mxu1 %vm333_vm1, %v1519_v39  ;;  %v507_v39 = vadd.f32 %v506_v42, %v1987_v58 }
 0x118   : > { %v2095_v44 = vpop.f32.mrf.mxu0  ;;  %v2097_v45 = vpop.f32.mrf.mxu1 }
 0x120   : > { %v704_v48 = vpop.f32.mrf.mxu0  ;;  %v753_v49 = vpop.f32.mrf.mxu1 }
 0x121   : > { %v793_v61 = vadd.f32 %v704_v48, %v502_v53  ;;  %v794_v3 = vadd.f32 %v753_v49, %v551_v54  ;;  %v556_v48 = vadd.f32 %v555_v43, %v1989_v59  ;;  %v509_v53 = vadd.f32 %v508_v46, %v1999_v62 }
 0x122   : > { %v558_v54 = vadd.f32 %v557_v47, %v2001_v63 }
 0x123   : > { %v831_v17 = vadd.f32 %v2104_v0, %v793_v61  ;;  %v832_v51 = vadd.f32 %v2106_v4, %v794_v3 }
 0x125   : > { %v863_v25 = vmax.f32 %v831_v17, 0.0  ;;  %v864_v28 = vmax.f32 %v832_v51, 0.0 }
 0x128   : > { %v706_v11 = vpop.f32.mrf.mxu0  ;;  %v755_v14 = vpop.f32.mrf.mxu1 }
 0x129   : > { %v795_v18 = vadd.f32 %v706_v11, %v504_v7  ;;  %v796_v52 = vadd.f32 %v755_v14, %v553_v10  ;;  %v516_v7 = vpop.f32.mrf.mxu2  ;;  %v565_v10 = vpop.f32.mrf.mxu3 }
 0x12b   : > { %v833_v21 = vadd.f32 %v2104_v0, %v795_v18  ;;  %v834_v24 = vadd.f32 %v2106_v4, %v796_v52 }
 0x12d   : > { %v865_v29 = vmax.f32 %v833_v21, 0.0  ;;  %v866_v30 = vmax.f32 %v834_v24, 0.0  ;;  %v512_v21 = vadd.f32 %v511_v57, %v2004_v1  ;;  %v561_v24 = vadd.f32 %v560_v60, %v2006_v2 }
 0x12f   : > { %v895_v34 = vpack.c.bf16 %v865_v29, %v863_v25  ;;  %v896_v56 = vpack.c.bf16 %v866_v30, %v864_v28 }
 0x130   : > { %v709_v35 = vpop.f32.mrf.mxu0  ;;  %v758_v36 = vpop.f32.mrf.mxu1 }
 0x131   : > { %1051 = vmatmul.bf16.vlgmr.msrb.gmra.mxu2 %v895_v34  ;;  %1100 = vmatmul.bf16.vlgmr.msrb.gmra.mxu3 %v896_v56  ;;  %v797_v49 = vadd.f32 %v709_v35, %v507_v39  ;;  %v798_v50 = vadd.f32 %v758_v36, %v556_v48  ;;  %v518_v25 = vpop.f32.mrf.mxu2  ;;  %v567_v28 = vpop.f32.mrf.mxu3  ;;  %v514_v34 = vadd.f32 %v513_v33, %v2016_v5 }
 0x132   : > { %v563_v56 = vadd.f32 %v562_v55, %v2018_v6 }
 0x133   : > { %v835_v11 = vadd.f32 %v2104_v0, %v797_v49  ;;  %v836_v14 = vadd.f32 %v2106_v4, %v798_v50 }
 0x135   : > { %v867_v42 = vmax.f32 %v835_v11, 0.0  ;;  %v868_v43 = vmax.f32 %v836_v14, 0.0  ;;  %v517_v11 = vadd.f32 %v516_v7, %v2021_v8  ;;  %v566_v14 = vadd.f32 %v565_v10, %v2023_v9 }
 0x138   : > { %v711_v61 = vpop.f32.mrf.mxu0  ;;  %v760_v3 = vpop.f32.mrf.mxu1 }
 0x139   : > { %v799_v17 = vadd.f32 %v711_v61, %v509_v53  ;;  %v800_v51 = vadd.f32 %v760_v3, %v558_v54  ;;  %v521_v57 = vpop.f32.mrf.mxu2  ;;  %v570_v60 = vpop.f32.mrf.mxu3 }
 0x13b   : > { %v837_v58 = vadd.f32 %v2104_v0, %v799_v17  ;;  %v838_v59 = vadd.f32 %v2106_v4, %v800_v51 }
 0x13d   : > { %v869_v18 = vmax.f32 %v837_v58, 0.0  ;;  %v870_v62 = vmax.f32 %v838_v59, 0.0  ;;  %v519_v58 = vadd.f32 %v518_v25, %v2033_v12  ;;  %v568_v59 = vadd.f32 %v567_v28, %v2035_v13 }
 0x13f   : > { %v897_v46 = vpack.c.bf16 %v869_v18, %v867_v42  ;;  %v898_v63 = vpack.c.bf16 %v870_v62, %v868_v43 }
 0x140   : > { %v714_v47 = vpop.f32.mrf.mxu0  ;;  %v763_v52 = vpop.f32.mrf.mxu1 }
 0x141   : > { %1056 = vmatmul.bf16.gmra.mxu2 %v897_v46  ;;  %1105 = vmatmul.bf16.gmra.mxu3 %v898_v63  ;;  %v801_v29 = vadd.f32 %v714_v47, %v512_v21  ;;  %v802_v30 = vadd.f32 %v763_v52, %v561_v24  ;;  %v523_v42 = vpop.f32.mrf.mxu2  ;;  %v572_v43 = vpop.f32.mrf.mxu3 }
 0x143   : > { %v839_v39 = vadd.f32 %v2104_v0, %v801_v29  ;;  %v840_v48 = vadd.f32 %v2106_v4, %v802_v30 }
 0x145   : > { %v871_v53 = vmax.f32 %v839_v39, 0.0  ;;  %v872_v54 = vmax.f32 %v840_v48, 0.0  ;;  %v524_v39 = vadd.f32 %v523_v42, %v2050_v19  ;;  %v573_v48 = vadd.f32 %v572_v43, %v2052_v20 }
 0x148   : > { %v716_v35 = vpop.f32.mrf.mxu0  ;;  %v765_v36 = vpop.f32.mrf.mxu1 }
 0x149   : > { %v803_v49 = vadd.f32 %v716_v35, %v514_v34  ;;  %v804_v50 = vadd.f32 %v765_v36, %v563_v56  ;;  %v526_v29 = vpop.f32.mrf.mxu2  ;;  %v575_v30 = vpop.f32.mrf.mxu3  ;;  %v522_v34 = vadd.f32 %v521_v57, %v2038_v15  ;;  %v571_v56 = vadd.f32 %v570_v60, %v2040_v16 }
 0x14b   : > { %v841_v1 = vadd.f32 %v2104_v0, %v803_v49  ;;  %v842_v2 = vadd.f32 %v2106_v4, %v804_v50 }
 0x14d   : > { %v873_v61 = vmax.f32 %v841_v1, 0.0  ;;  %v874_v5 = vmax.f32 %v842_v2, 0.0 }
 0x14f   : > { %v899_v33 = vpack.c.bf16 %v873_v61, %v871_v53  ;;  %v900_v6 = vpack.c.bf16 %v874_v5, %v872_v54 }
 0x150   : > { %v719_v55 = vpop.f32.mrf.mxu0  ;;  %v768_v3 = vpop.f32.mrf.mxu1 }
 0x151   : > { %1061 = vmatmul.bf16.gmra.mxu2 %v899_v33  ;;  %1110 = vmatmul.bf16.gmra.mxu3 %v900_v6  ;;  %v805_v17 = vadd.f32 %v719_v55, %v517_v11  ;;  %v806_v51 = vadd.f32 %v768_v3, %v566_v14  ;;  %v528_v61 = vpop.f32.mrf.mxu2  ;;  %v577_v5 = vpop.f32.mrf.mxu3  ;;  %v527_v11 = vadd.f32 %v526_v29, %v2055_v22 }
 0x152   : > { %v576_v14 = vadd.f32 %v575_v30, %v2057_v23  ;;  %v529_v42 = vadd.f32 %v528_v61, %v2067_v26  ;;  %v578_v43 = vadd.f32 %v577_v5, %v2069_v27 }
 0x153   : > { %v843_v46 = vadd.f32 %v2104_v0, %v805_v17  ;;  %v844_v63 = vadd.f32 %v2106_v4, %v806_v51 }
 0x155   : > { %v875_v7 = vmax.f32 %v843_v46, 0.0  ;;  %v876_v10 = vmax.f32 %v844_v63, 0.0 }
 0x158   : > { %v721_v18 = vpop.f32.mrf.mxu0  ;;  %v770_v62 = vpop.f32.mrf.mxu1 }
 0x159   : > { %v807_v47 = vadd.f32 %v721_v18, %v519_v58  ;;  %v808_v52 = vadd.f32 %v770_v62, %v568_v59  ;;  %v531_v17 = vpop.f32.mrf.mxu2  ;;  %v580_v51 = vpop.f32.mrf.mxu3 }
 0x15b   : > { %v845_v8 = vadd.f32 %v2104_v0, %v807_v47  ;;  %v846_v9 = vadd.f32 %v2106_v4, %v808_v52 }
 0x15d   : > { %v877_v21 = vmax.f32 %v845_v8, 0.0  ;;  %v878_v12 = vmax.f32 %v846_v9, 0.0 }
 0x15f   : > { %v901_v24 = vpack.c.bf16 %v877_v21, %v875_v7  ;;  %v902_v13 = vpack.c.bf16 %v878_v12, %v876_v10 }
 0x160   : > { %v724_v25 = vpop.f32.mrf.mxu0  ;;  %v773_v28 = vpop.f32.mrf.mxu1 }
 0x161   : > { %1066 = vmatmul.bf16.gmra.mxu2 %v901_v24  ;;  %1115 = vmatmul.bf16.gmra.mxu3 %v902_v13  ;;  %v809_v35 = vadd.f32 %v724_v25, %v522_v34  ;;  %v810_v36 = vadd.f32 %v773_v28, %v571_v56  ;;  %v533_v21 = vpop.f32.mrf.mxu2  ;;  %v582_v26 = vpop.f32.mrf.mxu3  ;;  %v532_v25 = vadd.f32 %v531_v17, %v2072_v31 }
 0x162   : > { %v581_v28 = vadd.f32 %v580_v51, %v2074_v32  ;;  %v534_v34 = vadd.f32 %v533_v21, %v2084_v37  ;;  %v583_v56 = vadd.f32 %v582_v26, %v2086_v38 }
 0x163   : > { %v847_v1 = vadd.f32 %v2104_v0, %v809_v35  ;;  %v848_v2 = vadd.f32 %v2106_v4, %v810_v36 }
 0x165   : > { %v879_v57 = vmax.f32 %v847_v1, 0.0  ;;  %v880_v60 = vmax.f32 %v848_v2, 0.0 }
 0x168   : > { %v726_v49 = vpop.f32.mrf.mxu0  ;;  %v775_v50 = vpop.f32.mrf.mxu1 }
 0x169   : > { %v811_v53 = vadd.f32 %v726_v49, %v524_v39  ;;  %v812_v54 = vadd.f32 %v775_v50, %v573_v48  ;;  %v536_v1 = vpop.f32.mrf.mxu2  ;;  %v585_v2 = vpop.f32.mrf.mxu3 }
 0x16b   : > { %v849_v15 = vadd.f32 %v2104_v0, %v811_v53  ;;  %v850_v16 = vadd.f32 %v2106_v4, %v812_v54 }
 0x16d   : > { %v881_v33 = vmax.f32 %v849_v15, 0.0  ;;  %v882_v19 = vmax.f32 %v850_v16, 0.0 }
 0x16f   : > { %v903_v6 = vpack.c.bf16 %v881_v33, %v879_v57  ;;  %v904_v20 = vpack.c.bf16 %v882_v19, %v880_v60  ;;  %v537_v57 = vadd.f32 %v536_v1, %v2089_v40  ;;  %v586_v60 = vadd.f32 %v585_v2, %v2091_v41 }
 0x170   : > { %v729_v55 = vpop.f32.mrf.mxu0  ;;  %v778_v3 = vpop.f32.mrf.mxu1 }
 0x171   : > { %1071 = vmatmul.bf16.gmra.mxu2 %v903_v6  ;;  %1120 = vmatmul.bf16.gmra.mxu3 %v904_v20  ;;  %v813_v58 = vadd.f32 %v729_v55, %v527_v11  ;;  %v814_v59 = vadd.f32 %v778_v3, %v576_v14  ;;  %v538_v33 = vpop.f32.mrf.mxu2  ;;  %v587_v19 = vpop.f32.mrf.mxu3 }
 0x172   : > { %v539_v55 = vadd.f32 %v538_v33, %v2095_v44  ;;  %v588_v3 = vadd.f32 %v587_v19, %v2097_v45 }
 0x173   : > { %v851_v46 = vadd.f32 %v2104_v0, %v813_v58  ;;  %v852_v63 = vadd.f32 %v2106_v4, %v814_v59 }
 0x175   : > { %v883_v8 = vmax.f32 %v851_v46, 0.0  ;;  %v884_v9 = vmax.f32 %v852_v63, 0.0 }
 0x178   : > { %v731_v18 = vpop.f32.mrf.mxu0  ;;  %v780_v62 = vpop.f32.mrf.mxu1 }
 0x179   : > { %v815_v47 = vadd.f32 %v731_v18, %v529_v42  ;;  %v816_v52 = vadd.f32 %v780_v62, %v578_v43 }
 0x17b   : > { %v853_v22 = vadd.f32 %v2104_v0, %v815_v47  ;;  %v854_v23 = vadd.f32 %v2106_v4, %v816_v52  ;;  %v2173_v47 = vld [vmem:[%s2254_s4] ss:$0 sm:$0xff] }
 0x17d   : > { %v885_v7 = vmax.f32 %v853_v22, 0.0  ;;  %v886_v10 = vmax.f32 %v854_v23, 0.0 }
 0x17f   : > { %v905_v12 = vpack.c.bf16 %v885_v7, %v883_v8  ;;  %v906_v27 = vpack.c.bf16 %v886_v10, %v884_v9 }
 0x180   : > { %v734_v24 = vpop.f32.mrf.mxu0  ;;  %v783_v13 = vpop.f32.mrf.mxu1 }
 0x181   : > { %1076 = vmatmul.bf16.gmra.mxu2 %v905_v12  ;;  %1125 = vmatmul.bf16.gmra.mxu3 %v906_v27  ;;  %v817_v29 = vadd.f32 %v734_v24, %v532_v25  ;;  %v818_v30 = vadd.f32 %v783_v13, %v581_v28 }
 0x183   : > { %v855_v39 = vadd.f32 %v2104_v0, %v817_v29  ;;  %v856_v48 = vadd.f32 %v2106_v4, %v818_v30 }
 0x185   : > { %v887_v53 = vmax.f32 %v855_v39, 0.0  ;;  %v888_v54 = vmax.f32 %v856_v48, 0.0 }
 0x188   : > { %v736_v35 = vpop.f32.mrf.mxu0  ;;  %v785_v36 = vpop.f32.mrf.mxu1 }
 0x189   : > { %v819_v49 = vadd.f32 %v736_v35, %v534_v34  ;;  %v820_v50 = vadd.f32 %v785_v36, %v583_v56 }
 0x18b   : > { %v857_v31 = vadd.f32 %v2104_v0, %v819_v49  ;;  %v858_v32 = vadd.f32 %v2106_v4, %v820_v50 }
 0x18d   : > { %v889_v61 = vmax.f32 %v857_v31, 0.0  ;;  %v890_v37 = vmax.f32 %v858_v32, 0.0 }
 0x18f   : > { %v907_v5 = vpack.c.bf16 %v889_v61, %v887_v53  ;;  %v908_v38 = vpack.c.bf16 %v890_v37, %v888_v54 }
 0x190   : > { %v739_v15 = vpop.f32.mrf.mxu0  ;;  %v788_v16 = vpop.f32.mrf.mxu1 }
 0x191   : > { %1081 = vmatmul.bf16.gmra.mxu2 %v907_v5  ;;  %1130 = vmatmul.bf16.gmra.mxu3 %v908_v38  ;;  %v821_v6 = vadd.f32 %v739_v15, %v537_v57  ;;  %v822_v20 = vadd.f32 %v788_v16, %v586_v60 }
 0x193   : > { %v859_v17 = vadd.f32 %v2104_v0, %v821_v6  ;;  %v860_v51 = vadd.f32 %v2106_v4, %v822_v20 }
 0x195   : > { %v891_v42 = vmax.f32 %v859_v17, 0.0  ;;  %v892_v43 = vmax.f32 %v860_v51, 0.0 }
 0x198   : > { %v741_v11 = vpop.f32.mrf.mxu0  ;;  %v790_v14 = vpop.f32.mrf.mxu1 }
 0x199   : > { %v823_v58 = vadd.f32 %v741_v11, %v539_v55  ;;  %v824_v59 = vadd.f32 %v790_v14, %v588_v3 }
 0x19b   : > { %v861_v40 = vadd.f32 %v2104_v0, %v823_v58  ;;  %v862_v41 = vadd.f32 %v2106_v4, %v824_v59 }
 0x19d   : > { %v893_v18 = vmax.f32 %v861_v40, 0.0  ;;  %v894_v44 = vmax.f32 %v862_v41, 0.0 }
 0x19f   : > { %v909_v62 = vpack.c.bf16 %v893_v18, %v891_v42  ;;  %v910_v45 = vpack.c.bf16 %v894_v44, %v892_v43 }
 0x1a1   : > { %1086 = vmatmul.bf16.gmra.mxu2 %v909_v62  ;;  %1135 = vmatmul.bf16.gmra.mxu3 %v910_v45 }
 0x1b4   : > { %v1052_v46 = vpop.f32.mrf.mxu2  ;;  %v1101_v63 = vpop.f32.mrf.mxu3 }
 0x1b5   : > { %v1053_v0 = vadd.f32 %v2173_v47, %v1052_v46 }
 0x1b7   : > { %v1102_v23 = vadd.f32 %v1101_v63, %v1053_v0 }
 0x1bc   : > { %v1054_v4 = vpop.f32.mrf.mxu2  ;;  %v1103_v52 = vpop.f32.mrf.mxu3 }
 0x1bd   : > { %v1055_v22 = vadd.f32 %v2173_v47, %v1054_v4 }
 0x1bf   : > { %v1104_v8 = vadd.f32 %v1103_v52, %v1055_v22 }
 0x1c1   : > { %v1541_v9 = vpack.c.bf16 %v1104_v8, %v1102_v23 }
 0x1c3   : > { %1542 = vst [vmem:[%s2180_s30] sm:$0xff] %v1541_v9  }
 0x1c4   : > { %v1057_v7 = vpop.f32.mrf.mxu2  ;;  %v1106_v10 = vpop.f32.mrf.mxu3 }
 0x1c5   : > { %v1058_v21 = vadd.f32 %v2173_v47, %v1057_v7 }
 0x1c7   : > { %v1107_v24 = vadd.f32 %v1106_v10, %v1058_v21 }
 0x1cc   : > { %v1059_v26 = vpop.f32.mrf.mxu2  ;;  %v1108_v12 = vpop.f32.mrf.mxu3 }
 0x1cd   : > { %v1060_v27 = vadd.f32 %v2173_v47, %v1059_v26 }
 0x1cf   : > { %v1109_v13 = vadd.f32 %v1108_v12, %v1060_v27 }
 0x1d1   : > { %v1546_v25 = vpack.c.bf16 %v1109_v13, %v1107_v24 }
 0x1d3   : > { %1578 = vst [vmem:[%s2180_s30 + $0x8] sm:$0xff] %v1546_v25  }
 0x1d4   : > { %v1062_v28 = vpop.f32.mrf.mxu2  ;;  %v1111_v29 = vpop.f32.mrf.mxu3 }
 0x1d5   : > { %v1063_v30 = vadd.f32 %v2173_v47, %v1062_v28 }
 0x1d7   : > { %v1112_v36 = vadd.f32 %v1111_v29, %v1063_v30 }
 0x1dc   : > { %v1064_v34 = vpop.f32.mrf.mxu2  ;;  %v1113_v56 = vpop.f32.mrf.mxu3 }
 0x1dd   : > { %v1065_v35 = vadd.f32 %v2173_v47, %v1064_v34 }
 0x1df   : > { %v1114_v39 = vadd.f32 %v1113_v56, %v1065_v35 }
 0x1e1   : > { %v1551_v48 = vpack.c.bf16 %v1114_v39, %v1112_v36 }
 0x1e3   : > { %1579 = vst [vmem:[%s2180_s30 + $0x10] sm:$0xff] %v1551_v48  }
 0x1e4   : > { %v1067_v49 = vpop.f32.mrf.mxu2  ;;  %v1116_v50 = vpop.f32.mrf.mxu3 }
 0x1e5   : > { %v1068_v1 = vadd.f32 %v2173_v47, %v1067_v49 }
 0x1e7   : > { %v1117_v53 = vadd.f32 %v1116_v50, %v1068_v1 }
 0x1ec   : > { %v1069_v2 = vpop.f32.mrf.mxu2  ;;  %v1118_v31 = vpop.f32.mrf.mxu3 }
 0x1ed   : > { %v1070_v32 = vadd.f32 %v2173_v47, %v1069_v2 }
 0x1ef   : > { %v1119_v54 = vadd.f32 %v1118_v31, %v1070_v32 }
 0x1f1   : > { %v1556_v61 = vpack.c.bf16 %v1119_v54, %v1117_v53 }
 0x1f3   : > { %1580 = vst [vmem:[%s2180_s30 + $0x18] sm:$0xff] %v1556_v61  }
 0x1f4   : > { %v1072_v37 = vpop.f32.mrf.mxu2  ;;  %v1121_v5 = vpop.f32.mrf.mxu3 }
 0x1f5   : > { %v1073_v38 = vadd.f32 %v2173_v47, %v1072_v37 }
 0x1f7   : > { %v1122_v60 = vadd.f32 %v1121_v5, %v1073_v38 }
 0x1fc   : > { %v1074_v15 = vpop.f32.mrf.mxu2  ;;  %v1123_v16 = vpop.f32.mrf.mxu3 }
 0x1fd   : > { %v1075_v57 = vadd.f32 %v2173_v47, %v1074_v15 }
 0x1ff   : > { %v1124_v33 = vadd.f32 %v1123_v16, %v1075_v57 }
 0x201   : > { %v1561_v19 = vpack.c.bf16 %v1124_v33, %v1122_v60 }
 0x203   : > { %1581 = vst [vmem:[%s2180_s30 + $0x20] sm:$0xff] %v1561_v19  }
 0x204   : > { %v1077_v6 = vpop.f32.mrf.mxu2  ;;  %v1126_v20 = vpop.f32.mrf.mxu3 }
 0x205   : > { %v1078_v55 = vadd.f32 %v2173_v47, %v1077_v6 }
 0x207   : > { %v1127_v17 = vadd.f32 %v1126_v20, %v1078_v55 }
 0x20c   : > { %v1079_v3 = vpop.f32.mrf.mxu2  ;;  %v1128_v11 = vpop.f32.mrf.mxu3 }
 0x20d   : > { %v1080_v14 = vadd.f32 %v2173_v47, %v1079_v3 }
 0x20f   : > { %v1129_v51 = vadd.f32 %v1128_v11, %v1080_v14 }
 0x211   : > { %v1566_v58 = vpack.c.bf16 %v1129_v51, %v1127_v17 }
 0x213   : > { %1582 = vst [vmem:[%s2180_s30 + $0x28] sm:$0xff] %v1566_v58  }
 0x214   : > { %v1082_v59 = vpop.f32.mrf.mxu2  ;;  %v1131_v40 = vpop.f32.mrf.mxu3 }
 0x215   : > { %v1083_v41 = vadd.f32 %v2173_v47, %v1082_v59 }
 0x217   : > { %v1132_v44 = vadd.f32 %v1131_v40, %v1083_v41 }
 0x21c   : > { %v1084_v42 = vpop.f32.mrf.mxu2  ;;  %v1133_v43 = vpop.f32.mrf.mxu3 }
 0x21d   : > { %v1085_v18 = vadd.f32 %v2173_v47, %v1084_v42 }
 0x21f   : > { %v1134_v62 = vadd.f32 %v1133_v43, %v1085_v18 }
 0x221   : > { %v1571_v45 = vpack.c.bf16 %v1134_v62, %v1132_v44 }
 0x223   : > { %1583 = vst [vmem:[%s2180_s30 + $0x30] sm:$0xff] %v1571_v45  }
 0x224   : > { %v1087_v46 = vpop.f32.mrf.mxu2  ;;  %v1136_v63 = vpop.f32.mrf.mxu3 }
 0x225   : > { %v1088_v0 = vadd.f32 %v2173_v47, %v1087_v46 }
 0x227   : > { %v1137_v23 = vadd.f32 %v1136_v63, %v1088_v0 }
 0x22c   : > { %v1089_v4 = vpop.f32.mrf.mxu2  ;;  %v1138_v22 = vpop.f32.mrf.mxu3 }
 0x22d   : > { %v1090_v52 = vadd.f32 %v2173_v47, %v1089_v4 }
 0x22f   : > { %v1139_v8 = vadd.f32 %v1138_v22, %v1090_v52 }
 0x231   : > { %v1576_v9 = vpack.c.bf16 %v1139_v8, %v1137_v23 }
 0x233   : > { %1584 = vst [vmem:[%s2180_s30 + $0x38] sm:$0xff] %v1576_v9  }
 0x234   : > { %1688 = shalt.err (!%p1685_p7)
}
 0x235   : > { %s1757_s17 = smov 64   ;;  %s1758_s30 = smov 4  }
 0x236   : > { %1587 = dma.vmem_to_hbm [thread:$0]  (%p1840_p3), %s1189_s15, 1024, %s1191_s21, %s1174_s22, %s1757_s17, %s1757_s17, %s1758_s30  }
 0x237 PF: > { %p1593_p9 = scmp.ge.s32.totalorder %s1755_s25, 2  ;;  %s1205_s14 = sand.u32 1, %s1727_s18  }
 0x238   : > { %s1206_s26 = scalar_lea.sflag [#allocation3], %s1205_s14 }
 0x239   : > { %p1590_p10 = pnand %p1593_p9, %p1849_p8 }
 0x23b   : > { %p1591_p11 = pneg %p1590_p10 }
 0x23d   : > { %1722 = dma.done.wait (%p1591_p11), %s1206_s26, 1024  }
 0x23e   : > { %1724 = vsyncadd (%p1591_p11), %s1206_s26, 4294966272  ;;  %s18_s25 = sadd.s32 1, %s1755_s25   ;;  %s2258_s18 = smov %s1731_s19 }
 0x23f   : > { %p15_p12 = scmp.ge.s32.totalorder %s18_s25, 6   ;;  %s2259_s19 = smov %s1735_s20 }
 0x240   : > { %s2260_s20 = smov %s1858_s11  ;;  %s2261_s21 = smov %s1747_s23 }
 0x241   : > { %s2262_s22 = smov %s1751_s24  ;;  %s2263_s23 = smov %s2266_s28 }
 0x242   : > { %s2264_s24 = smov %s2270_s29  ;;  %17 = sbr.rel (!%p15_p12) target bundleno = 5 (0x5), region = 77 }
 0x247   :  { %1212 = vsyncpa [#allocation3], 1 }
 0x248   :  { %1214 = vsyncpa [#allocation3 + $0x1], 1 }

</bundles_post_ra>
